<compile_context>
chip_gen: v6e
topology: v6e:2x2x1
jax: 0.10.0
libtpu: 0.0.40
codegen_flags: <defaults>
</compile_context>

<pallas_src>
import jax
import jax.numpy as jnp
from jax.experimental import pallas as pl
from jax.experimental.pallas import tpu as pltpu  # noqa: F401  (TPU backend)


def linear_kernel(x_ref, wb_ref, o_ref):
    # x_ref : (2, 12) f32   -- input pre-transposed: rows = in-features, lanes = rows of x
    # wb_ref: (3, 3)  f32   -- packed params: wb[:, 0:2] = W (out,in), wb[:, 2:3] = bias
    # o_ref : (3, 12) f32   -- transposed output: rows = out-features, lanes = rows of x
    x = x_ref[...]
    wb = wb_ref[...]
    # y^T = W @ x^T + b, expressed as two VPU broadcast FMAs (K=2) along the
    # 12-wide lane axis -- no MXU, no in-kernel transpose/relayout.
    y_t = wb[:, 0:1] * x[0:1, :] + wb[:, 1:2] * x[1:2, :] + wb[:, 2:3]
    o_ref[...] = y_t.astype(o_ref.dtype)


def model_forward(x, weight, bias):
    """x: (4, 3, 2) f32, weight: (3, 2) f32 (PyTorch layout), bias: (3,) f32 -> (12, 3) f32."""
    x_t = x.reshape(12, 2).T                                   # (2, 12) -- trace-time layout op
    wb = jnp.concatenate([weight, bias.reshape(3, 1)], axis=1)  # (3, 3) packed params, 1 DMA
    out_t = pl.pallas_call(
        linear_kernel,
        out_shape=jax.ShapeDtypeStruct((3, 12), jnp.float32),
        in_specs=[
            pl.BlockSpec((2, 12), lambda: (0, 0)),
            pl.BlockSpec((3, 3), lambda: (0, 0)),
        ],
        out_specs=pl.BlockSpec((3, 12), lambda: (0, 0)),
        cost_estimate=pl.CostEstimate(flops=72, bytes_accessed=276, transcendentals=0),
    )(x_t, wb)
    return out_t.T                                             # (12, 3)


if __name__ == "__main__":
    key = jax.random.PRNGKey(0)
    kx, kw, kb = jax.random.split(key, 3)

    # Input matching the module's implied shape.
    x = jax.random.normal(kx, (4, 3, 2), dtype=jnp.float32)

    # Deterministic parameter init, PyTorch nn.Linear default: U(-1/sqrt(in), 1/sqrt(in))
    in_features, out_features = 2, 3
    bound = 1.0 / (in_features ** 0.5)
    weight = jax.random.uniform(kw, (out_features, in_features),
                                dtype=jnp.float32, minval=-bound, maxval=bound)
    bias = jax.random.uniform(kb, (out_features,),
                              dtype=jnp.float32, minval=-bound, maxval=bound)

    out = model_forward(x, weight, bias)
    out = jax.block_until_ready(out)

    # Sanity check against plain-JAX reference (exact nn.Linear semantics).
    ref = x.reshape(12, 2) @ weight.T + bias
    assert out.shape == (12, 3)
    assert jnp.allclose(out, ref, atol=1e-5, rtol=1e-5)

    print("KERNEL_OK")
</pallas_src>

<mosaic_0001>
module attributes {stable_mosaic.version = 11 : i64} {
  func.func @linear_kernel(%arg0: memref<2x12xf32, #tpu.memory_space<vmem>>, %arg1: memref<3x3xf32, #tpu.memory_space<vmem>>, %arg2: memref<3x12xf32, #tpu.memory_space<vmem>>) attributes {dimension_semantics = [], scalar_prefetch = 0 : i64, scratch_operands = 0 : i64, tpu.core_type = #tpu.core_type<tc>} {
    %c0 = arith.constant 0 : index
    %c0_0 = arith.constant 0 : index
    %0 = vector.load %arg0[%c0, %c0_0] : memref<2x12xf32, #tpu.memory_space<vmem>>, vector<2x12xf32>
    %c0_1 = arith.constant 0 : index
    %c0_2 = arith.constant 0 : index
    %1 = vector.load %arg1[%c0_1, %c0_2] : memref<3x3xf32, #tpu.memory_space<vmem>>, vector<3x3xf32>
    %2 = vector.extract_strided_slice %1 {offsets = [0, 0], sizes = [3, 1], strides = [1, 1]} : vector<3x3xf32> to vector<3x1xf32>
    %3 = vector.extract_strided_slice %0 {offsets = [0, 0], sizes = [1, 12], strides = [1, 1]} : vector<2x12xf32> to vector<1x12xf32>
    %4 = vector.broadcast %2 : vector<3x1xf32> to vector<3x12xf32>
    %5 = vector.broadcast %3 : vector<1x12xf32> to vector<3x12xf32>
    %6 = arith.mulf %4, %5 : vector<3x12xf32>
    %7 = vector.extract_strided_slice %1 {offsets = [0, 1], sizes = [3, 1], strides = [1, 1]} : vector<3x3xf32> to vector<3x1xf32>
    %8 = vector.extract_strided_slice %0 {offsets = [1, 0], sizes = [1, 12], strides = [1, 1]} : vector<2x12xf32> to vector<1x12xf32>
    %9 = vector.broadcast %7 : vector<3x1xf32> to vector<3x12xf32>
    %10 = vector.broadcast %8 : vector<1x12xf32> to vector<3x12xf32>
    %11 = arith.mulf %9, %10 : vector<3x12xf32>
    %12 = arith.addf %6, %11 : vector<3x12xf32>
    %13 = vector.extract_strided_slice %1 {offsets = [0, 2], sizes = [3, 1], strides = [1, 1]} : vector<3x3xf32> to vector<3x1xf32>
    %14 = vector.broadcast %13 : vector<3x1xf32> to vector<3x12xf32>
    %15 = arith.addf %12, %14 : vector<3x12xf32>
    %c0_3 = arith.constant 0 : index
    %c0_4 = arith.constant 0 : index
    %16 = vector.load %arg2[%c0_3, %c0_4] : memref<3x12xf32, #tpu.memory_space<vmem>>, vector<3x12xf32>
    tpu.vector_store %arg2[%c0_3, %c0_4], %15 {strides = array<i32>} : memref<3x12xf32, #tpu.memory_space<vmem>>, vector<3x12xf32>,
    return
  }
}

</mosaic_0001>

<bundles_post_ra>
// kernel: tpu_custom_call.1
= control target key start
LH: loop header
LB: loop body
LE: loop exit
PB: predicated region body
PF: predicated region fallthrough
CT: control target
= control target key end

     0   :  { %7 = vsyncpa [#allocation3], 0  ;;  %s187_s0 = inlined_call_operand.hbm [shape: f32[2,12], index: 0, kind: input, shape index: {}]   ;;  %s188_s1 = inlined_call_operand.hbm [shape: f32[3,3], index: 1, kind: input, shape index: {}]   ;;  %s189_s2 = inlined_call_operand.hbm [shape: f32[3,12], index: 2, kind: output, shape index: {}]  }
   0x1   :  { %8 = vsyncpa [#allocation6], 0 }
   0x2   :  { %9 = vsyncpa [#allocation4], 0  ;;  %s157_s9 = smov [#allocation2]   ;;  %s158_s11 = smov [#allocation5]  }
   0x3   :  { %s16_s10 = sshll.u32 %s157_s9, 4  ;;  %s26_s12 = sshll.u32 %s158_s11, 4  ;;  %s17_s10 = int_to_ptr.vmem [resolvable:$true] %s16_s10  ;;  %s27_s12 = int_to_ptr.vmem [resolvable:$true] %s26_s12 }
   0x4   :  { %s99_s13 = scalar_lea.vmem %s17_s10, 32  ;;  %p104_p1 = scmp.lt.s32.totalorder %s17_s10, %s17_s10 }
   0x5   :  { %p100_p0 = scmp.ne.s32.totalorder %s17_s10, %s99_s13  ;;  %p105_p2 = scmp.lt.s32.totalorder %s99_s13, %s99_s13 }
   0x7   :  { %p106_p3 = por %p105_p2, %p104_p1 }
   0x9   :  { %p107_p4 = pnand %p106_p3, %p100_p0 }
   0xb   :  { %110 = shalt.err (!%p107_p4)
}
   0xc   :  { %19 = dma.hbm_to_vmem [thread:$0]  %s187_s0, 32, %s17_s10, [#allocation3]  }
   0xd   :  { %s119_s16 = scalar_lea.vmem %s27_s12, 64  ;;  %p124_p6 = scmp.lt.s32.totalorder %s27_s12, %s27_s12 }
   0xe   :  { %p120_p5 = scmp.ne.s32.totalorder %s27_s12, %s119_s16  ;;  %p125_p7 = scmp.lt.s32.totalorder %s119_s16, %s119_s16 }
  0x10   :  { %p126_p8 = por %p125_p7, %p124_p6 }
  0x12   :  { %p127_p9 = pnand %p126_p8, %p120_p5 }
  0x14   :  { %130 = shalt.err (!%p127_p9)
}
  0x15   :  { %29 = dma.hbm_to_vmem [thread:$0]  %s188_s1, 64, %s27_s12, [#allocation6]  }
  0x16   :  { %151 = dma.done.wait [#allocation3], 32  }
  0x17   :  { %152 = vsyncadd [#allocation3], 4294967264 }
  0x18   :  { %153 = dma.done.wait [#allocation6], 64  }
  0x19   :  { %154 = vsyncadd [#allocation6], 4294967232  ;;  %v159_v0 = vmov 0   ;;  %v160_v1 = vmov 2   ;;  %v37_v2 = vld [vmem:[#allocation5] sm:$0x7]  ;;  %v43_v4 = vlaneseq }
  0x1a   :  { %87 = vset.pattern.permute.xlu0 %v159_v0  ;;  %89 = vset.pattern.permute.xlu1 %v160_v1  ;;  %v161_v3 = vmov 1   ;;  %v36_v8 = vld [vmem:[#allocation2] sm:$0x3]  ;;  %s162_s0 = smov [#allocation7]   ;;  %vm63_vm0 = vcmask 92160  }
  0x1b   :  { %40 = vperm.xlu0 %87, %v37_v2   ;;  %59 = vperm.xlu1 %89, %v37_v2   ;;  %v44_v5 = vshrl.u32 %v43_v4, 7  ;;  %s71_s1 = sshll.u32 %s162_s0, 4  ;;  %s72_s1 = int_to_ptr.vmem [resolvable:$true] %s71_s1 }
  0x1c   :  { %s131_s19 = scalar_lea.vmem %s72_s1, 64  ;;  %p136_p11 = scmp.lt.s32.totalorder %s72_s1, %s72_s1 }
  0x1d   :  { %v45_v6 = vsub.s32 0, %v44_v5  ;;  %v54_v7 = vsub.s32 1, %v44_v5  ;;  %p132_p10 = scmp.ne.s32.totalorder %s72_s1, %s131_s19  ;;  %p137_p12 = scmp.lt.s32.totalorder %s131_s19, %s131_s19 }
  0x1f   :  { %88 = vset.pattern.permute.xlu0 %v161_v3  ;;  %v46_v10 = vrot.slane %v36_v8, %v45_v6  ;;  %v55_v11 = vrot.slane %v36_v8, %v54_v7  ;;  %p138_p13 = por %p137_p12, %p136_p11 }
  0x20   :  { %49 = vperm.xlu0 %88, %v37_v2  }
  0x21   :  { %p139_p0 = pnand %p138_p13, %p132_p10 }
  0x24   :  { %90 = vset.pattern.permute.xlu0 %v160_v1 }
  0x96   :  { %v41_v9 = vpop.permute.xlu0 %40  ;;  %v60_v15 = vpop.permute.xlu1 %59 }
  0x97   :  { %v47_v13 = vmul.f32 %v46_v10, %v41_v9 }
  0x9b   :  { %v50_v12 = vpop.permute.xlu0 %49 }
  0x9c   :  { %v56_v14 = vmul.f32 %v55_v11, %v50_v12 }
  0x9e   :  { %v57_v16 = vadd.f32 %v56_v14, %v47_v13 }
  0xa0   :  { %v62_v17 = vadd.f32 %v60_v15, %v57_v16 }
  0xa2   :  { %64 = vst.msk [vmem:[#allocation7] sm:$0x7] %vm63_vm0, %v62_v17 }
  0xa3   :  { %142 = shalt.err (!%p139_p0)
}
  0xa4   :  { %74 = dma.vmem_to_hbm [thread:$0]  %s72_s1, 64, %s189_s2, [#allocation4]  }
  0xa5   :  { %155 = dma.done.wait [#allocation4], 64  }
  0xa6   :  { %156 = vsyncadd [#allocation4], 4294967232 }
  0xa7   :  { %78 = vsyncpa [#allocation3], 1 }
  0xa8   :  { %79 = vsyncpa [#allocation6], 1 }
  0xa9   :  { %80 = vsyncpa [#allocation4], 1 }

</bundles_post_ra>
